<compile_context>
chip_gen: v6e
topology: v6e:2x2x1
jax: 0.10.0
libtpu: 0.0.40
codegen_flags: <defaults>
</compile_context>

<pallas_src>
import jax
import jax.numpy as jnp
from jax.experimental import pallas as pl
from jax.experimental.pallas import tpu as pltpu


def _round_up(x, m):
    return ((x + m - 1) // m) * m


def _cdiv(a, b):
    return (a + b - 1) // b


def _transition_kernel(s_ref, w1_ref, b1_ref, w2_ref, b2_ref, w3_ref, b3_ref,
                       o_ref):
    s0 = s_ref[...]                       # (bm, c) residual, native dtype
    mxu_dt = w1_ref.dtype                 # weights define the MXU operand dtype

    # Hoist bias loads/casts once per tile (JAX does not CSE broadcast_in_dim).
    b1 = b1_ref[...].astype(jnp.float32)
    b2 = b2_ref[...].astype(jnp.float32)
    b3 = b3_ref[...].astype(jnp.float32)

    # linear_1 + ReLU   (bias add / ReLU kept in f32: v5e has no bf16 VPU path)
    h = jnp.dot(s0.astype(mxu_dt), w1_ref[...],
                preferred_element_type=jnp.float32) + b1
    h = jnp.maximum(h, 0.0)
    # linear_2 + ReLU
    h = jnp.dot(h.astype(mxu_dt), w2_ref[...],
                preferred_element_type=jnp.float32) + b2
    h = jnp.maximum(h, 0.0)
    # linear_3 + residual
    h = jnp.dot(h.astype(mxu_dt), w3_ref[...],
                preferred_element_type=jnp.float32) + b3
    o_ref[...] = (h + s0.astype(jnp.float32)).astype(o_ref.dtype)


def _vmem_budget_bytes():
    """Generation-aware VMEM budget (v7x: 64 MiB physical, v5e/v6e: 128 MiB)."""
    try:
        phys = int(pltpu.get_tpu_info().vmem_capacity_bytes)
    except Exception:
        phys = 64 << 20            # unknown chip: assume the smallest (v7x)
    return int(min(96 << 20, phys * 5 // 8))


def _choose_block_m(rows, c, c_p, act_bytes, w_bytes, vmem_budget):
    """Row-tile size: fill the VMEM budget, keep per-step activation traffic
    around >= ~2 MiB (amortise ~0.35us/step pipeline overhead), and keep the
    step count megacore-friendly (even or >= 8) for v7x's two TensorCores."""
    align = {4: 8, 2: 16, 1: 32}.get(act_bytes, 8)

    # Resident parameters; default BlockSpec pipelining double-buffers them.
    param_elems = 2 * c * c_p + c_p * c_p + 2 * c_p + c
    params_resident = 2 * param_elems * w_bytes
    # Per-row VMEM: in + out (double-buffered, native dtype) + ~3 live f32 temps.
    per_row = 2 * 2 * max(c, c_p) * act_bytes + 3 * c_p * 4
    avail = vmem_budget - params_resident - (2 << 20)
    bm = avail // per_row if avail > 0 else align

    # Per-step HBM traffic target (in + out activation bytes), capped at 4096 rows.
    traffic_rows = _cdiv(2 << 20, max(1, 2 * c * act_bytes))
    cap = min(4096, max(512, traffic_rows))
    bm = max(align, min(bm, cap))

    if bm >= 128:
        bm = (bm // 128) * 128                # full MXU passes when there is room
    else:
        bm = max(align, (bm // align) * align)
    bm = min(bm, _round_up(rows, align))      # don't exceed the actual work

    # v7x megacore: avoid 1 or 3 grid steps when there is enough work.
    steps = _cdiv(rows, bm)
    if steps < 8 and steps % 2 == 1 and rows >= 256:
        bm2 = max(align, _round_up(_cdiv(rows, steps + 1), align))
        if bm2 < bm:
            bm = bm2
    return int(bm)


def structure_transition(s, params, *, block_m=None, vmem_budget=None,
                         use_bf16_matmul=False):
    """Fused StructureTransitionLayer forward.

    s:      (..., c) activations.
    params: dict with w1/w2/w3 stored transposed as (c_in, c_out), b1/b2/b3 as (c,).
    block_m: optional explicit row tile (must be a multiple of 8).
    use_bf16_matmul: run the MXU in bf16 (f32 accumulate) for f32 inputs (v5e).
    """
    orig_shape = s.shape
    c = orig_shape[-1]
    rows = 1
    for d in orig_shape[:-1]:
        rows *= d
    s2d = s.reshape(rows, c)

    w1, w2, w3 = params["w1"], params["w2"], params["w3"]
    b1, b2, b3 = params["b1"], params["b2"], params["b3"]

    if use_bf16_matmul and w1.dtype == jnp.float32:
        w1 = w1.astype(jnp.bfloat16)
        w2 = w2.astype(jnp.bfloat16)
        w3 = w3.astype(jnp.bfloat16)

    # Lane-pad ONLY the hidden dimension of the parameters (one-off, tiny).
    # Activations are fed unpadded: first matmul uses K=c, last weight is
    # (c_p, c) so exactly c output columns are produced -> no extra HBM passes.
    c_p = _round_up(c, 128)
    if c_p != c:
        dc = c_p - c
        w1 = jnp.pad(w1, ((0, 0), (0, dc)))    # (c,   c_p)
        w2 = jnp.pad(w2, ((0, dc), (0, dc)))   # (c_p, c_p)
        w3 = jnp.pad(w3, ((0, dc), (0, 0)))    # (c_p, c  )
        b1 = jnp.pad(b1, (0, dc))
        b2 = jnp.pad(b2, (0, dc))
    b1 = b1.reshape(1, c_p)
    b2 = b2.reshape(1, c_p)
    b3 = b3.reshape(1, c)

    act_bytes = jnp.dtype(s.dtype).itemsize
    w_bytes = jnp.dtype(w1.dtype).itemsize
    if vmem_budget is None:
        vmem_budget = _vmem_budget_bytes()
    bm = block_m if block_m is not None else _choose_block_m(
        rows, c, c_p, act_bytes, w_bytes, vmem_budget)

    # Ragged last tile: OOB reads only feed their own (masked) output rows; safe
    # because every op in the kernel is row-independent.
    grid = (_cdiv(rows, bm),)
    row_spec = pl.BlockSpec((bm, c), lambda i: (i, 0))

    def const(shape):
        return pl.BlockSpec(shape, lambda i: (0, 0))

    param_elems = 2 * c * c_p + c_p * c_p + 2 * c_p + c
    flops = 2 * rows * c_p * (2 * c + c_p) + rows * (3 * c_p + 2 * c)
    bytes_accessed = 2 * rows * c * act_bytes + param_elems * w_bytes

    vmem_est = (2 * 2 * bm * max(c, c_p) * act_bytes     # in + out, double-buffered
                + 2 * param_elems * w_bytes              # params, double-buffered
                + 4 * bm * c_p * 4)                      # f32 intermediates
    vmem_limit = int(max(32 << 20, min(vmem_est + (8 << 20),
                                       vmem_budget + (16 << 20))))

    out = pl.pallas_call(
        _transition_kernel,
        out_shape=jax.ShapeDtypeStruct((rows, c), s.dtype),
        grid_spec=pltpu.PrefetchScalarGridSpec(
            num_scalar_prefetch=0,
            grid=grid,
            in_specs=[row_spec,
                      const((c, c_p)), const((1, c_p)),
                      const((c_p, c_p)), const((1, c_p)),
                      const((c_p, c)), const((1, c))],
            out_specs=row_spec,
        ),
        compiler_params=pltpu.CompilerParams(
            dimension_semantics=("parallel",),
            vmem_limit_bytes=vmem_limit,
        ),
        cost_estimate=pl.CostEstimate(
            flops=int(flops), transcendentals=0,
            bytes_accessed=int(bytes_accessed)),
    )(s2d, w1, b1, w2, b2, w3, b3)

    return out.reshape(orig_shape)


def make_params(key, c, dtype=jnp.float32):
    k1, k2, k3, k4, k5, k6 = jax.random.split(key, 6)
    scale = 1.0 / float(c) ** 0.5
    return {
        "w1": (jax.random.normal(k1, (c, c), jnp.float32) * scale).astype(dtype),
        "b1": (jax.random.normal(k2, (c,), jnp.float32) * 0.1).astype(dtype),
        "w2": (jax.random.normal(k3, (c, c), jnp.float32) * scale).astype(dtype),
        "b2": (jax.random.normal(k4, (c,), jnp.float32) * 0.1).astype(dtype),
        "w3": (jax.random.normal(k5, (c, c), jnp.float32) * scale).astype(dtype),
        "b3": (jax.random.normal(k6, (c,), jnp.float32) * 0.1).astype(dtype),
    }


def _reference(s, p):
    x0 = s.astype(jnp.float32)
    w1 = p["w1"].astype(jnp.float32); b1 = p["b1"].astype(jnp.float32)
    w2 = p["w2"].astype(jnp.float32); b2 = p["b2"].astype(jnp.float32)
    w3 = p["w3"].astype(jnp.float32); b3 = p["b3"].astype(jnp.float32)
    x = jnp.maximum(x0 @ w1 + b1, 0.0)
    x = jnp.maximum(x @ w2 + b2, 0.0)
    x = x @ w3 + b3
    return x + x0


if __name__ == "__main__":
    key = jax.random.PRNGKey(0)

    # Test 1: f32, lane-dense c=128, enough rows for an even (megacore) step count.
    k1, k2, key = jax.random.split(key, 3)
    batch, seq, c = 2, 256, 128
    s = jax.random.normal(k1, (batch, seq, c), jnp.float32)
    p = make_params(k2, c, jnp.float32)
    out = jax.block_until_ready(structure_transition(s, p))
    ref = _reference(s, p)
    assert out.shape == s.shape and out.dtype == s.dtype
    assert jnp.allclose(out.astype(jnp.float32), ref, atol=1e-4, rtol=1e-4), \
        "f32 mismatch vs reference"

    # Test 2: bf16 activations/weights, non-128 channel count (no activation pad).
    k1, k2, key = jax.random.split(key, 3)
    batch, seq, c = 1, 200, 64
    s = jax.random.normal(k1, (batch, seq, c), jnp.float32).astype(jnp.bfloat16)
    p = make_params(k2, c, jnp.bfloat16)
    out = jax.block_until_ready(structure_transition(s, p))
    ref = _reference(s, p)
    assert out.shape == s.shape and out.dtype == jnp.bfloat16
    assert jnp.allclose(out.astype(jnp.float32), ref, atol=2e-1, rtol=5e-2), \
        "bf16 mismatch vs reference"

    # Test 3: small non-lane-dense c=32 (only params are lane-padded).
    k1, k2, key = jax.random.split(key, 3)
    batch, seq, c = 2, 8, 32
    s = jax.random.normal(k1, (batch, seq, c), jnp.float32)
    p = make_params(k2, c, jnp.float32)
    out = jax.block_until_ready(structure_transition(s, p))
    ref = _reference(s, p)
    assert out.shape == s.shape
    assert jnp.allclose(out.astype(jnp.float32), ref, atol=1e-4, rtol=1e-4), \
        "small-channel mismatch vs reference"

    # Test 4: ragged row tile (rows not divisible by block_m), explicit block_m.
    k1, k2, key = jax.random.split(key, 3)
    batch, seq, c = 2, 13, 128
    s = jax.random.normal(k1, (batch, seq, c), jnp.float32)
    p = make_params(k2, c, jnp.float32)
    out = jax.block_until_ready(structure_transition(s, p, block_m=16))
    ref = _reference(s, p)
    assert jnp.allclose(out.astype(jnp.float32), ref, atol=1e-4, rtol=1e-4), \
        "ragged-tile mismatch vs reference"

    # Test 5: f32 inputs on the bf16-MXU path (v5e compute-bound option).
    k1, k2, key = jax.random.split(key, 3)
    batch, seq, c = 1, 64, 128
    s = jax.random.normal(k1, (batch, seq, c), jnp.float32)
    p = make_params(k2, c, jnp.float32)
    out = jax.block_until_ready(structure_transition(s, p, use_bf16_matmul=True))
    ref = _reference(s, p)
    assert out.dtype == jnp.float32
    assert jnp.allclose(out, ref, atol=2e-1, rtol=5e-2), \
        "bf16-MXU-path mismatch vs reference"

    print("KERNEL_OK")
</pallas_src>

<mosaic_0001>
module attributes {stable_mosaic.version = 11 : i64} {
  func.func @_transition_kernel(%arg0: i32, %arg1: memref<256x128xf32, #tpu.memory_space<vmem>>, %arg2: memref<128x128xf32, #tpu.memory_space<vmem>>, %arg3: memref<1x128xf32, #tpu.memory_space<vmem>>, %arg4: memref<128x128xf32, #tpu.memory_space<vmem>>, %arg5: memref<1x128xf32, #tpu.memory_space<vmem>>, %arg6: memref<128x128xf32, #tpu.memory_space<vmem>>, %arg7: memref<1x128xf32, #tpu.memory_space<vmem>>, %arg8: memref<256x128xf32, #tpu.memory_space<vmem>>) attributes {dimension_semantics = [#tpu.dimension_semantics<parallel>], iteration_bounds = array<i64: 2>, scalar_prefetch = 0 : i64, scratch_operands = 0 : i64, tpu.core_type = #tpu.core_type<tc>, window_params = [{transform_indices = @transform_0, window_bounds = array<i64: 256, 128>}, {pipeline_mode = #tpu.pipeline_mode<synchronous>, transform_indices = @transform_1, window_bounds = array<i64: 128, 128>}, {pipeline_mode = #tpu.pipeline_mode<synchronous>, transform_indices = @transform_2, window_bounds = array<i64: 1, 128>}, {pipeline_mode = #tpu.pipeline_mode<synchronous>, transform_indices = @transform_3, window_bounds = array<i64: 128, 128>}, {pipeline_mode = #tpu.pipeline_mode<synchronous>, transform_indices = @transform_4, window_bounds = array<i64: 1, 128>}, {pipeline_mode = #tpu.pipeline_mode<synchronous>, transform_indices = @transform_5, window_bounds = array<i64: 128, 128>}, {pipeline_mode = #tpu.pipeline_mode<synchronous>, transform_indices = @transform_6, window_bounds = array<i64: 1, 128>}, {transform_indices = @transform_7, window_bounds = array<i64: 256, 128>}]} {
    %c0 = arith.constant 0 : index
    %c0_0 = arith.constant 0 : index
    %0 = vector.load %arg1[%c0, %c0_0] : memref<256x128xf32, #tpu.memory_space<vmem>>, vector<256x128xf32>
    %c0_1 = arith.constant 0 : index
    %c0_2 = arith.constant 0 : index
    %1 = vector.load %arg3[%c0_1, %c0_2] : memref<1x128xf32, #tpu.memory_space<vmem>>, vector<1x128xf32>
    %c0_3 = arith.constant 0 : index
    %c0_4 = arith.constant 0 : index
    %2 = vector.load %arg5[%c0_3, %c0_4] : memref<1x128xf32, #tpu.memory_space<vmem>>, vector<1x128xf32>
    %c0_5 = arith.constant 0 : index
    %c0_6 = arith.constant 0 : index
    %3 = vector.load %arg7[%c0_5, %c0_6] : memref<1x128xf32, #tpu.memory_space<vmem>>, vector<1x128xf32>
    %c0_7 = arith.constant 0 : index
    %c0_8 = arith.constant 0 : index
    %4 = vector.load %arg2[%c0_7, %c0_8] : memref<128x128xf32, #tpu.memory_space<vmem>>, vector<128x128xf32>
    %cst = arith.constant dense<0.000000e+00> : vector<256x128xf32>
    %5 = tpu.matmul %0, %4, %cst {dimension_numbers = #tpu.dot_dimension_numbers<[1], [0], [0], [1], [0, 0, 1, 1], [], []>} : vector<256x128xf32>, vector<128x128xf32>, vector<256x128xf32> -> vector<256x128xf32>
    %6 = vector.broadcast %1 : vector<1x128xf32> to vector<256x128xf32>
    %7 = arith.addf %5, %6 : vector<256x128xf32>
    %cst_9 = arith.constant 0.000000e+00 : f32
    %8 = vector.broadcast %cst_9 : f32 to vector<256x128xf32>
    %9 = arith.maximumf %7, %8 : vector<256x128xf32>
    %c0_10 = arith.constant 0 : index
    %c0_11 = arith.constant 0 : index
    %10 = vector.load %arg4[%c0_10, %c0_11] : memref<128x128xf32, #tpu.memory_space<vmem>>, vector<128x128xf32>
    %cst_12 = arith.constant dense<0.000000e+00> : vector<256x128xf32>
    %11 = tpu.matmul %9, %10, %cst_12 {dimension_numbers = #tpu.dot_dimension_numbers<[1], [0], [0], [1], [0, 0, 1, 1], [], []>} : vector<256x128xf32>, vector<128x128xf32>, vector<256x128xf32> -> vector<256x128xf32>
    %12 = vector.broadcast %2 : vector<1x128xf32> to vector<256x128xf32>
    %13 = arith.addf %11, %12 : vector<256x128xf32>
    %cst_13 = arith.constant 0.000000e+00 : f32
    %14 = vector.broadcast %cst_13 : f32 to vector<256x128xf32>
    %15 = arith.maximumf %13, %14 : vector<256x128xf32>
    %c0_14 = arith.constant 0 : index
    %c0_15 = arith.constant 0 : index
    %16 = vector.load %arg6[%c0_14, %c0_15] : memref<128x128xf32, #tpu.memory_space<vmem>>, vector<128x128xf32>
    %cst_16 = arith.constant dense<0.000000e+00> : vector<256x128xf32>
    %17 = tpu.matmul %15, %16, %cst_16 {dimension_numbers = #tpu.dot_dimension_numbers<[1], [0], [0], [1], [0, 0, 1, 1], [], []>} : vector<256x128xf32>, vector<128x128xf32>, vector<256x128xf32> -> vector<256x128xf32>
    %18 = vector.broadcast %3 : vector<1x128xf32> to vector<256x128xf32>
    %19 = arith.addf %17, %18 : vector<256x128xf32>
    %20 = arith.addf %19, %0 : vector<256x128xf32>
    %c0_17 = arith.constant 0 : index
    %c0_18 = arith.constant 0 : index
    %21 = vector.load %arg8[%c0_17, %c0_18] : memref<256x128xf32, #tpu.memory_space<vmem>>, vector<256x128xf32>
    tpu.vector_store %arg8[%c0_17, %c0_18], %20 {strides = array<i32>} : memref<256x128xf32, #tpu.memory_space<vmem>>, vector<256x128xf32>,
    return
  }
  func.func @transform_0(%arg0: i32) -> (i32, i32) {
    %c0_i32 = arith.constant 0 : i32
    %c0_i32_0 = arith.constant 0 : i32
    return %arg0, %c0_i32 : i32, i32
  }
  func.func @transform_1(%arg0: i32) -> (i32, i32) {
    %c0_i32 = arith.constant 0 : i32
    %c0_i32_0 = arith.constant 0 : i32
    %c0_i32_1 = arith.constant 0 : i32
    return %c0_i32, %c0_i32_0 : i32, i32
  }
  func.func @transform_2(%arg0: i32) -> (i32, i32) {
    %c0_i32 = arith.constant 0 : i32
    %c0_i32_0 = arith.constant 0 : i32
    %c0_i32_1 = arith.constant 0 : i32
    return %c0_i32, %c0_i32_0 : i32, i32
  }
  func.func @transform_3(%arg0: i32) -> (i32, i32) {
    %c0_i32 = arith.constant 0 : i32
    %c0_i32_0 = arith.constant 0 : i32
    %c0_i32_1 = arith.constant 0 : i32
    return %c0_i32, %c0_i32_0 : i32, i32
  }
  func.func @transform_4(%arg0: i32) -> (i32, i32) {
    %c0_i32 = arith.constant 0 : i32
    %c0_i32_0 = arith.constant 0 : i32
    %c0_i32_1 = arith.constant 0 : i32
    return %c0_i32, %c0_i32_0 : i32, i32
  }
  func.func @transform_5(%arg0: i32) -> (i32, i32) {
    %c0_i32 = arith.constant 0 : i32
    %c0_i32_0 = arith.constant 0 : i32
    %c0_i32_1 = arith.constant 0 : i32
    return %c0_i32, %c0_i32_0 : i32, i32
  }
  func.func @transform_6(%arg0: i32) -> (i32, i32) {
    %c0_i32 = arith.constant 0 : i32
    %c0_i32_0 = arith.constant 0 : i32
    %c0_i32_1 = arith.constant 0 : i32
    return %c0_i32, %c0_i32_0 : i32, i32
  }
  func.func @transform_7(%arg0: i32) -> (i32, i32) {
    %c0_i32 = arith.constant 0 : i32
    %c0_i32_0 = arith.constant 0 : i32
    return %arg0, %c0_i32 : i32, i32
  }
}

</mosaic_0001>

<bundles_post_ra>
// kernel: tpu_custom_call.1
= control target key start
LH: loop header
LB: loop body
LE: loop exit
PB: predicated region body
PF: predicated region fallthrough
CT: control target
= control target key end

     0   :  { %s2647_s0 = inlined_call_operand.hbm [shape: f32[512,128], index: 0, kind: input, shape index: {}]   ;;  %s2648_s1 = inlined_call_operand.hbm [shape: f32[128,128], index: 1, kind: input, shape index: {}]   ;;  %s2649_s2 = inlined_call_operand.vmem [shape: f32[1,128], index: 2, kind: input, shape index: {}]   ;;  %s2650_s3 = inlined_call_operand.hbm [shape: f32[128,128], index: 3, kind: input, shape index: {}]   ;;  %s2651_s4 = inlined_call_operand.vmem [shape: f32[1,128], index: 4, kind: input, shape index: {}]   ;;  %s2652_s5 = inlined_call_operand.hbm [shape: f32[128,128], index: 5, kind: input, shape index: {}]   ;;  %s2653_s6 = inlined_call_operand.vmem [shape: f32[1,128], index: 6, kind: input, shape index: {}]   ;;  %s2654_s7 = inlined_call_operand.hbm [shape: f32[512,128], index: 7, kind: output, shape index: {}]  }
   0x1   :  { %2661 = sst [smem:[#allocation15_spill]] %s2648_s1 }
   0x2   :  { %12 = vsyncpa [#allocation3], 0 }
   0x3   :  { %14 = vsyncpa [#allocation3 + $0x1], 0 }
   0x4   :  { %15 = vsyncpa [#allocation6], 0 }
   0x5   :  { %16 = vsyncpa [#allocation9], 0 }
   0x6   :  { %17 = vsyncpa [#allocation4], 0 }
   0x7   :  { %19 = vsyncpa [#allocation4 + $0x1], 0  ;;  %s2114_s24 = smov 0   ;;  %s2116_s25 = smov 0  }
   0x8   :  { %s2118_s26 = smov 0   ;;  %s2120_s27 = smov 0  }
   0x9 LB: > { %s2135_s28 = sadd.s32 4294967295, %s2063_s27   ;;  %s1363_s29 = sadd.s32 4294967294, %s2063_s27   ;;  %s2063_s27 = sphi %s2120_s27, %s2683_s27   ;;  %s2059_s26 = sphi %s2118_s26, %s2682_s26   ;;  %s2055_s25 = sphi %s2116_s25, %s2681_s25   ;;  %s2051_s24 = sphi %s2114_s24, %s2680_s24  }
   0xa   : > { %p45_p0 = scmp.ne.s32.totalorder %s2055_s25, %s2051_s24  ;;  %p2655_p1 = scmp.eq.s32.totalorder %s2135_s28, 0 }
   0xb   : > { %p195_p2 = scmp.eq.s32.totalorder %s2135_s28, 1  ;;  %p201_p3 = scmp.eq.s32.totalorder %s1363_s29, 1 }
   0xc   : > { %p2144_p4 = por %p2655_p1, %p45_p0  ;;  %p1364_p5 = scmp.ge.s32.totalorder %s2063_s27, 1 }
   0xd   : > { %p2149_p6 = por %p201_p3, %p45_p0  ;;  %p208_p7 = scmp.lt.s32.totalorder %s2063_s27, 3 }
   0xe   : > { %s2662_s30 = scalar_select %p2144_p4, 1, 0 }
   0xf   : > { %s2663_s8 = scalar_select %p2149_p6, 1, 0 }
  0x10   : > { %p2154_p8 = pnand %p1364_p5, %p208_p7  ;;  %s2065_s10 = smov [#allocation5]  }
  0x11   : > { %s220_s11 = sshll.u32 %s2065_s10, 4  ;;  %s2066_s13 = smov [#allocation7]   ;;  %s221_s11 = int_to_ptr.vmem [resolvable:$true] %s220_s11 }
  0x12   : > { %s2664_s9 = scalar_select %p2154_p8, 1, 0 }
  0x13   : > { %p1820_p9 = pneg %p2154_p8  ;;  %s236_s14 = sshll.u32 %s2066_s13, 4  ;;  %s237_s14 = int_to_ptr.vmem [resolvable:$true] %s236_s14 }
  0x14   : > { %s2067_s15 = smov [#allocation8]   ;;  %s1896_s17 = scalar_lea.vmem %s221_s11, 2048 }
  0x15   : > { %p2163_p11 = pnand %p1820_p9, %p2655_p1  ;;  %s252_s16 = sshll.u32 %s2067_s15, 4  ;;  %s253_s16 = int_to_ptr.vmem [resolvable:$true] %s252_s16 }
  0x16   : > { %p1897_p13 = scmp.ne.s32.totalorder %s221_s11, %s1896_s17  ;;  %p1904_p5 = scmp.lt.s32.totalorder %s221_s11, %s221_s11 }
  0x17   : > { %p1887_p12 = pneg %p2163_p11  ;;  %p1905_p7 = scmp.lt.s32.totalorder %s1896_s17, %s1896_s17 }
  0x19   : > { %p1899_p0 = pnand %p1897_p13, %p1887_p12  ;;  %p1906_p9 = por %p1905_p7, %p1904_p5 }
  0x1b   : > { %p1900_p3 = pneg %p1899_p0 }
  0x1d   : > { %p1907_p10 = pnand %p1906_p9, %p1900_p3 }
  0x1f   : > { %1910 = shalt.err (!%p1907_p10)
}
  0x20   : > { %s2656_s18 = smov 128   ;;  %s2657_s19 = smov 8  }
  0x21   : > { %s2666_s1 = sld [smem:[#allocation15_spill]]  ;;  %s1922_s22 = scalar_lea.vmem %s237_s14, 2048 }
  0x22   : > { %p1923_p13 = scmp.ne.s32.totalorder %s237_s14, %s1922_s22  ;;  %p1930_p3 = scmp.lt.s32.totalorder %s237_s14, %s237_s14 }
  0x23   : > { %p1931_p10 = scmp.lt.s32.totalorder %s1922_s22, %s1922_s22 }
  0x24   : > { %p1925_p0 = pnand %p1923_p13, %p1887_p12 }
  0x25   : > { %p1932_p7 = por %p1931_p10, %p1930_p3 }
  0x26   : > { %p1926_p5 = pneg %p1925_p0 }
  0x27   : > { %1823 = dma.hbm_to_vmem [thread:$0]  (!%p2163_p11), %s2666_s1, 2048, %s221_s11, [#allocation6], %s2656_s18, %s2656_s18, %s2657_s19  }
  0x28   : > { %p1933_p9 = pnand %p1932_p7, %p1926_p5 }
  0x2a   : > { %1936 = shalt.err (!%p1933_p9)
}
  0x2b   : > { %1826 = dma.hbm_to_vmem [thread:$0]  (!%p2163_p11), %s2650_s3, 2048, %s237_s14, [#allocation6], %s2656_s18, %s2656_s18, %s2657_s19  }
  0x2c   : > { %s1948_s10 = scalar_lea.vmem %s253_s16, 2048  ;;  %p1956_p3 = scmp.lt.s32.totalorder %s253_s16, %s253_s16 }
  0x2d   : > { %p1949_p1 = scmp.ne.s32.totalorder %s253_s16, %s1948_s10  ;;  %p1957_p5 = scmp.lt.s32.totalorder %s1948_s10, %s1948_s10 }
  0x2f   : > { %p1951_p13 = pnand %p1949_p1, %p1887_p12  ;;  %p1958_p10 = por %p1957_p5, %p1956_p3 }
  0x31   : > { %p1952_p0 = pneg %p1951_p13 }
  0x33   : > { %p1959_p7 = pnand %p1958_p10, %p1952_p0 }
  0x35   : > { %1962 = shalt.err (!%p1959_p7)
}
  0x36   : > { %1829 = dma.hbm_to_vmem [thread:$0]  (!%p2163_p11), %s2652_s5, 2048, %s253_s16, [#allocation9], %s2656_s18, %s2656_s18, %s2657_s19  }
  0x37   : > { %s2203_s14 = sadd.s32 1, %s2063_s27   ;;  %s32_s15 = sadd.s32 1, %s2059_s26 }
  0x38   : > { %s29_s12 = ssub.s32 %s2063_s27, %s2203_s14  ;;  %p39_p12 = scmp.ne.s32.totalorder %s2059_s26, %s2055_s25 }
  0x39   : > { %p30_p1 = scmp.eq.s32.totalorder %s29_s12, 0  ;;  %p40_p9 = scmp.eq.s32.totalorder %s2063_s27, 0 }
  0x3a   : > { %p1841_p13 = scmp.lt.s32.totalorder %s2063_s27, 2  ;;  %p2217_p3 = por %p195_p2, %p39_p12 }
  0x3b   : > { %s2213_s17 = scalar_select %p30_p1, %s2059_s26, %s32_s15  }
  0x3c   : > { %p41_p0 = por %p40_p9, %p39_p12  ;;  %s269_s21 = sand.u32 1, %s2059_s26  }
  0x3d   : > { %s2667_s20 = scalar_select %p2217_p3, 1, 0 }
  0x3e   : > { %s1386_s22 = sshll.u32 %s2063_s27, 12  ;;  %s1369_s16 = sshll.u32 %s269_s21, 8 }
  0x3f   : > { %s2226_s10 = scalar_lea.hbm %s2647_s0, %s1386_s22  ;;  %s273_s11 = scalar_lea.vmem [#allocation2], %s1369_s16 }
  0x40   : > { %s280_s13 = sshll.u32 %s273_s11, 4  ;;  %p2228_p11 = pnand %p1841_p13, %p41_p0  ;;  %s2232_s13 = int_to_ptr.vmem [resolvable:$true] %s280_s13 }
  0x41   : > { %s2234_s15 = scalar_lea.sflag [#allocation3], %s269_s21  ;;  %s1963_s18 = scalar_lea.hbm %s2226_s10, 4096 }
  0x42   : > { %p1964_p2 = scmp.ne.s32.totalorder %s2226_s10, %s1963_s18  ;;  %p1965_p5 = pneg %p2228_p11 }
  0x43   : > { %s1968_s16 = scalar_lea.hbm %s2647_s0, 8192  ;;  %p1969_p1 = scmp.lt.s32.totalorder %s2226_s10, %s2647_s0 }
  0x44   : > { %p1966_p10 = pnand %p1965_p5, %p1964_p2  ;;  %p1970_p12 = scmp.lt.s32.totalorder %s1968_s16, %s1963_s18 }
  0x46   : > { %p1967_p7 = pneg %p1966_p10  ;;  %p1971_p9 = por %p1970_p12, %p1969_p1 }
  0x48   : > { %p1972_p13 = pnand %p1971_p9, %p1967_p7 }
  0x4a   : > { %1975 = shalt.err (!%p1972_p13)
}
  0x4b   : > { %s1976_s21 = scalar_lea.vmem %s2232_s13, 4096  ;;  %s2070_s19 = smov [#allocation2]  }
  0x4c   : > { %p1977_p0 = scmp.ne.s32.totalorder %s2232_s13, %s1976_s21  ;;  %s1981_s1 = sshll.u32 %s2070_s19, 4  ;;  %s1982_s1 = int_to_ptr.vmem [resolvable:$false] %s1981_s1 }
  0x4d   : > { %s1983_s22 = scalar_lea.vmem %s1982_s1, 8192  ;;  %p1984_p10 = scmp.lt.s32.totalorder %s2232_s13, %s1982_s1 }
  0x4e   : > { %p1979_p6 = pnand %p1977_p0, %p1965_p5  ;;  %p1985_p3 = scmp.lt.s32.totalorder %s1983_s22, %s1976_s21 }
  0x50   : > { %p1980_p2 = pneg %p1979_p6  ;;  %p1986_p4 = por %p1985_p3, %p1984_p10 }
  0x52   : > { %p1987_p8 = pnand %p1986_p4, %p1980_p2 }
  0x54   : > { %1990 = shalt.err (!%p1987_p8)
}
  0x55   : > { %s2669_s18 = smov 8   ;;  %s2670_s23 = smov 128  }
  0x56   : > { %1833 = dma.hbm_to_vmem [thread:$0]  (!%p2228_p11), %s2226_s10, 4096, %s2232_s13, %s2234_s15, %s2670_s23, %s2670_s23, %s2669_s18  }
  0x57   : > { %p2671_p6 = scmp.ne.s32.totalorder %s2664_s9, 0 }
  0x58   : > { %s2261_s19 = sand.u32 (!%p2671_p6), 1, %s2055_s25   ;;  %p2672_p4 = scmp.ne.s32.totalorder (!%p2671_p6), %s2662_s30, 0 }
  0x59   : > { %292 = sbr.rel (%p2671_p6) target bundleno = 808 (0x328), region = 48  ;;  %s1373_s1 = sshll.u32 (!%p2671_p6), %s2261_s19, 8 }
  0x5a   : > { %s295_s16 = scalar_lea.sflag (!%p2671_p6), [#allocation3], %s2261_s19  ;;  %s2267_s12 = scalar_lea.vmem (!%p2671_p6), [#allocation2], %s1373_s1 }
  0x5e   : > { %2034 = dma.done.wait (%p2672_p4), %s295_s16, 4096  }
  0x5f   : > { %2036 = vsyncadd (%p2672_p4), %s295_s16, 4294963200  ;;  %p2673_p8 = scmp.eq.s32.totalorder %s2135_s28, 0 }
  0x61   : > { %2038 = dma.done.wait (%p2673_p8), [#allocation6], 4096   ;;  %p2674_p3 = pmov %p2673_p8 }
  0x63   : > { %2040 = vsyncadd (%p2674_p3), [#allocation6], 4294963200  ;;  %p2675_p11 = pmov %p2674_p3 }
  0x64   : > { %p2676_p5 = pmov %p2674_p3 }
  0x65   : > { %2042 = dma.done.wait (%p2675_p11), [#allocation9], 2048  }
  0x66   : > { %2044 = vsyncadd (%p2676_p5), [#allocation9], 4294965248  ;;  %v393_v0 = vld [vmem:[#allocation5 + $0x78] sm:$0xff]  ;;  %v392_v1 = vld [vmem:[#allocation5 + $0x70] sm:$0xff]  ;;  %s2502_s11 = scalar_lea.vmem [#allocation10], %s1373_s1  ;;  %s1387_s21 = sshll.u32 %s2135_s28, 12 }
  0x67   : > { %1532 = vmatprep.subr.mxu0 %v393_v0  ;;  %1772 = vmatprep.subr.mxu1 %v393_v0  ;;  %v391_v2 = vld [vmem:[#allocation5 + $0x68] sm:$0xff]  ;;  %v390_v3 = vld [vmem:[#allocation5 + $0x60] sm:$0xff]  ;;  %v389_v5 = vld [vmem:[#allocation5 + $0x58] sm:$0xff]  ;;  %s1261_s22 = sshll.u32 %s2502_s11, 4  ;;  %s2599_s1 = scalar_lea.hbm %s2654_s7, %s1387_s21  ;;  %s2601_s22 = int_to_ptr.vmem [resolvable:$true] %s1261_s22 }
  0x68   : > { %1533 = vmatpush3.msra.mxu0 %v393_v0  ;;  %1788 = vmatpush3.msra.mxu1 %v393_v0  ;;  %v2282_v4 = vld [vmem:[%s2267_s12] sm:$0xff]  ;;  %v388_v6 = vld [vmem:[#allocation5 + $0x50] sm:$0xff]  ;;  %v387_v7 = vld [vmem:[#allocation5 + $0x48] sm:$0xff]  ;;  %s1248_s28 = scalar_lea.sflag [#allocation4], %s2261_s19  ;;  %s1991_s16 = scalar_lea.vmem %s2601_s22, 4096 }
  0x69   : > { %1534 = vmatprep.subr.mxu0 %v392_v1  ;;  %1773 = vmatprep.subr.mxu1 %v392_v1  ;;  %v386_v8 = vld [vmem:[#allocation5 + $0x40] sm:$0xff]  ;;  %v385_v9 = vld [vmem:[#allocation5 + $0x38] sm:$0xff]  ;;  %v384_v10 = vld [vmem:[#allocation5 + $0x30] sm:$0xff]  ;;  %p1992_p7 = scmp.ne.s32.totalorder %s2601_s22, %s1991_s16  ;;  %p2677_p1 = scmp.ne.s32.totalorder %s2667_s20, 0 }
  0x6a   : > { %1535 = vmatpush3.msra.mxu0 %v392_v1  ;;  %1789 = vmatpush3.msra.mxu1 %v392_v1  ;;  %v383_v11 = vld [vmem:[#allocation5 + $0x28] sm:$0xff]  ;;  %v382_v12 = vld [vmem:[#allocation5 + $0x20] sm:$0xff]  ;;  %v381_v13 = vld [vmem:[#allocation5 + $0x18] sm:$0xff] }
  0x6b   : > { %1536 = vmatprep.subr.mxu0 %v391_v2  ;;  %1774 = vmatprep.subr.mxu1 %v391_v2  ;;  %v380_v14 = vld [vmem:[#allocation5 + $0x10] sm:$0xff]  ;;  %v379_v15 = vld [vmem:[#allocation5 + $0x8] sm:$0xff]  ;;  %v378_v16 = vld [vmem:[#allocation5] sm:$0xff]  ;;  %p1993_p12 = pnand %p1992_p7, %p2677_p1 }
  0x6c   : > { %1537 = vmatpush3.msra.mxu0 %v391_v2  ;;  %1564 = vmatprep.mubr.f32.mxu0 %v2282_v4  ;;  %v2286_v17 = vld [vmem:[%s2267_s12 + $0x8] sm:$0xff]  ;;  %v2289_v18 = vld [vmem:[%s2267_s12 + $0x10] sm:$0xff]  ;;  %v2292_v19 = vld [vmem:[%s2267_s12 + $0x80] sm:$0xff] }
  0x6d   : > { %1538 = vmatprep.subr.mxu0 %v390_v3  ;;  %1790 = vmatpush3.msra.mxu1 %v391_v2  ;;  %v2295_v20 = vld [vmem:[%s2267_s12 + $0x88] sm:$0xff]  ;;  %v672_v21 = vld [vmem:[#allocation7 + $0x78] sm:$0xff]  ;;  %v2299_v22 = vld [vmem:[%s2267_s12 + $0x90] sm:$0xff]  ;;  %p1994_p9 = pneg %p1993_p12 }
  0x6e   : > { %1539 = vmatpush3.msra.mxu0 %v390_v3  ;;  %1775 = vmatprep.subr.mxu1 %v390_v3  ;;  %v2303_v23 = vld [vmem:[%s2267_s12 + $0x18] sm:$0xff]  ;;  %v671_v24 = vld [vmem:[#allocation7 + $0x70] sm:$0xff]  ;;  %v2307_v25 = vld [vmem:[%s2267_s12 + $0x20] sm:$0xff] }
  0x6f   : > { %1540 = vmatprep.subr.mxu0 %v389_v5  ;;  %1791 = vmatpush3.msra.mxu1 %v390_v3  ;;  %v2312_v26 = vld [vmem:[%s2267_s12 + $0x98] sm:$0xff]  ;;  %v670_v27 = vld [vmem:[#allocation7 + $0x68] sm:$0xff]  ;;  %v2316_v28 = vld [vmem:[%s2267_s12 + $0xa0] sm:$0xff] }
  0x70   : > { %1541 = vmatpush3.msra.mxu0 %v389_v5  ;;  %1776 = vmatprep.subr.mxu1 %v389_v5  ;;  %v2320_v29 = vld [vmem:[%s2267_s12 + $0x28] sm:$0xff]  ;;  %v669_v30 = vld [vmem:[#allocation7 + $0x60] sm:$0xff]  ;;  %v2323_v31 = vld [vmem:[%s2267_s12 + $0x30] sm:$0xff] }
  0x71   : > { %1542 = vmatprep.subr.mxu0 %v388_v6  ;;  %1792 = vmatpush3.msra.mxu1 %v389_v5  ;;  %v2328_v32 = vld [vmem:[%s2267_s12 + $0xa8] sm:$0xff]  ;;  %v668_v33 = vld [vmem:[#allocation7 + $0x58] sm:$0xff]  ;;  %v2332_v34 = vld [vmem:[%s2267_s12 + $0xb0] sm:$0xff] }
  0x72   : > { %1543 = vmatpush3.msra.mxu0 %v388_v6  ;;  %1777 = vmatprep.subr.mxu1 %v388_v6  ;;  %v2336_v35 = vld [vmem:[%s2267_s12 + $0x38] sm:$0xff]  ;;  %v667_v36 = vld [vmem:[#allocation7 + $0x50] sm:$0xff]  ;;  %v2339_v37 = vld [vmem:[%s2267_s12 + $0x40] sm:$0xff] }
  0x73   : > { %1544 = vmatprep.subr.mxu0 %v387_v7  ;;  %1793 = vmatpush3.msra.mxu1 %v388_v6  ;;  %v2344_v38 = vld [vmem:[%s2267_s12 + $0xb8] sm:$0xff]  ;;  %v666_v39 = vld [vmem:[#allocation7 + $0x48] sm:$0xff]  ;;  %v2348_v40 = vld [vmem:[%s2267_s12 + $0xc0] sm:$0xff] }
  0x74   : > { %1545 = vmatpush3.msra.mxu0 %v387_v7  ;;  %1778 = vmatprep.subr.mxu1 %v387_v7  ;;  %v2352_v41 = vld [vmem:[%s2267_s12 + $0x48] sm:$0xff]  ;;  %v665_v42 = vld [vmem:[#allocation7 + $0x40] sm:$0xff]  ;;  %v2355_v43 = vld [vmem:[%s2267_s12 + $0x50] sm:$0xff] }
  0x75   : > { %1546 = vmatprep.subr.mxu0 %v386_v8  ;;  %1794 = vmatpush3.msra.mxu1 %v387_v7  ;;  %v2360_v44 = vld [vmem:[%s2267_s12 + $0xc8] sm:$0xff]  ;;  %v664_v45 = vld [vmem:[#allocation7 + $0x38] sm:$0xff]  ;;  %v2364_v46 = vld [vmem:[%s2267_s12 + $0xd0] sm:$0xff] }
  0x76   : > { %1547 = vmatpush3.msra.mxu0 %v386_v8  ;;  %1779 = vmatprep.subr.mxu1 %v386_v8  ;;  %v2368_v47 = vld [vmem:[%s2267_s12 + $0x58] sm:$0xff]  ;;  %v663_v48 = vld [vmem:[#allocation7 + $0x30] sm:$0xff]  ;;  %v2371_v49 = vld [vmem:[%s2267_s12 + $0x60] sm:$0xff] }
  0x77   : > { %1548 = vmatprep.subr.mxu0 %v385_v9  ;;  %1795 = vmatpush3.msra.mxu1 %v386_v8  ;;  %v2376_v50 = vld [vmem:[%s2267_s12 + $0xd8] sm:$0xff]  ;;  %v662_v51 = vld [vmem:[#allocation7 + $0x28] sm:$0xff]  ;;  %v2380_v52 = vld [vmem:[%s2267_s12 + $0xe0] sm:$0xff] }
  0x78   : > { %1549 = vmatpush3.msra.mxu0 %v385_v9  ;;  %1780 = vmatprep.subr.mxu1 %v385_v9  ;;  %v2384_v53 = vld [vmem:[%s2267_s12 + $0x68] sm:$0xff]  ;;  %v661_v54 = vld [vmem:[#allocation7 + $0x20] sm:$0xff]  ;;  %v2387_v55 = vld [vmem:[%s2267_s12 + $0x70] sm:$0xff] }
  0x79   : > { %1550 = vmatprep.subr.mxu0 %v384_v10  ;;  %1796 = vmatpush3.msra.mxu1 %v385_v9  ;;  %v2392_v56 = vld [vmem:[%s2267_s12 + $0xe8] sm:$0xff]  ;;  %v660_v57 = vld [vmem:[#allocation7 + $0x18] sm:$0xff]  ;;  %v2396_v58 = vld [vmem:[%s2267_s12 + $0xf0] sm:$0xff] }
  0x7a   : > { %1551 = vmatpush3.msra.mxu0 %v384_v10  ;;  %1781 = vmatprep.subr.mxu1 %v384_v10  ;;  %v2400_v59 = vld [vmem:[%s2267_s12 + $0x78] sm:$0xff]  ;;  %v659_v61 = vld [vmem:[#allocation7 + $0x10] sm:$0xff]  ;;  %v658_v62 = vld [vmem:[#allocation7 + $0x8] sm:$0xff] }
  0x7b   : > { %1552 = vmatprep.subr.mxu0 %v383_v11  ;;  %1797 = vmatpush3.msra.mxu1 %v384_v10  ;;  %v2405_v60 = vld [vmem:[%s2267_s12 + $0xf8] sm:$0xff]  ;;  %v657_v63 = vld [vmem:[#allocation7] sm:$0xff]  ;;  %v950_v1 = vld [vmem:[#allocation8 + $0x70] sm:$0xff]  ;;  %s2071_s12 = smov [#allocation10]  }
  0x7c   : > { %1553 = vmatpush3.msra.mxu0 %v383_v11  ;;  %1782 = vmatprep.subr.mxu1 %v383_v11  ;;  %v951_v0 = vld [vmem:[#allocation8 + $0x78] sm:$0xff]  ;;  %v949_v2 = vld [vmem:[#allocation8 + $0x68] sm:$0xff]  ;;  %v948_v3 = vld [vmem:[#allocation8 + $0x60] sm:$0xff]  ;;  %s1995_s30 = sshll.u32 %s2071_s12, 4  ;;  %s1996_s30 = int_to_ptr.vmem [resolvable:$false] %s1995_s30 }
  0x7d   : > { %1554 = vmatprep.subr.mxu0 %v382_v12  ;;  %1798 = vmatpush3.msra.mxu1 %v383_v11  ;;  %v947_v5 = vld [vmem:[#allocation8 + $0x58] sm:$0xff]  ;;  %v946_v6 = vld [vmem:[#allocation8 + $0x50] sm:$0xff]  ;;  %v945_v7 = vld [vmem:[#allocation8 + $0x48] sm:$0xff]  ;;  %s1997_s9 = scalar_lea.vmem %s1996_s30, 8192  ;;  %p1998_p13 = scmp.lt.s32.totalorder %s2601_s22, %s1996_s30 }
  0x7e   : > { %1555 = vmatpush3.msra.mxu0 %v382_v12  ;;  %1783 = vmatprep.subr.mxu1 %v382_v12  ;;  %v944_v8 = vld [vmem:[#allocation8 + $0x40] sm:$0xff]  ;;  %v943_v9 = vld [vmem:[#allocation8 + $0x38] sm:$0xff]  ;;  %v942_v10 = vld [vmem:[#allocation8 + $0x30] sm:$0xff]  ;;  %p1999_p0 = scmp.lt.s32.totalorder %s1997_s9, %s1991_s16 }
  0x7f   : > { %1556 = vmatprep.subr.mxu0 %v381_v13  ;;  %1799 = vmatpush3.msra.mxu1 %v382_v12  ;;  %v941_v11 = vld [vmem:[#allocation8 + $0x28] sm:$0xff]  ;;  %v940_v12 = vld [vmem:[#allocation8 + $0x20] sm:$0xff] }
  0x80   : > { %1557 = vmatpush3.msra.mxu0 %v381_v13  ;;  %1784 = vmatprep.subr.mxu1 %v381_v13  ;;  %p2000_p2 = por %p1999_p0, %p1998_p13 }
  0x81   : > { %1558 = vmatprep.subr.mxu0 %v380_v14  ;;  %1800 = vmatpush3.msra.mxu1 %v381_v13  ;;  %v939_v13 = vld [vmem:[#allocation8 + $0x18] sm:$0xff] }
  0x82   : > { %1559 = vmatpush3.msra.mxu0 %v380_v14  ;;  %1785 = vmatprep.subr.mxu1 %v380_v14  ;;  %p2001_p10 = pnand %p2000_p2, %p1994_p9 }
  0x83   : > { %1560 = vmatprep.subr.mxu0 %v379_v15  ;;  %1801 = vmatpush3.msra.mxu1 %v380_v14  ;;  %v2412_v14 = vld [vmem:[%s2649_s2] ss:$0 sm:$0xff] }
  0x84   : > { %1561 = vmatpush3.msra.mxu0 %v379_v15  ;;  %1786 = vmatprep.subr.mxu1 %v379_v15 }
  0x85   : > { %1562 = vmatprep.subr.mxu0 %v378_v16  ;;  %1802 = vmatpush3.msra.mxu1 %v379_v15 }
  0x86   : > { %1563 = vmatpush3.msra.mxu0 %v378_v16  ;;  %1787 = vmatprep.subr.mxu1 %v378_v16 }
  0x87   : > { %1565 = vmatmul.mubr.f32.vlgmr.msra.gmra.mxu0 %v2286_v17  ;;  %1803 = vmatpush3.msra.mxu1 %v378_v16 }
  0x88   : > { %1567 = vmatprep.mubr.f32.mxu0 %v2289_v18  ;;  %1588 = vmatprep.mubr.f32.mxu1 %v2292_v19 }
  0x89   : > { %1589 = vmatmul.mubr.f32.vlgmr.msra.gmra.mxu1 %v2295_v20  ;;  %1612 = vmatprep.subr.mxu1 %v672_v21 }
  0x8a   : > { %1591 = vmatprep.mubr.f32.mxu1 %v2299_v22  ;;  %1613 = vmatpush3.msra.mxu1 %v672_v21 }
  0x8b   : > { %1568 = vmatmul.mubr.f32.gmra.mxu0 %v2303_v23  ;;  %1614 = vmatprep.subr.mxu1 %v671_v24 }
  0x8c   : > { %1570 = vmatprep.mubr.f32.mxu0 %v2307_v25  ;;  %1615 = vmatpush3.msra.mxu1 %v671_v24 }
  0x8d   : > { %1592 = vmatmul.mubr.f32.gmra.mxu1 %v2312_v26  ;;  %1616 = vmatprep.subr.mxu1 %v670_v27 }
  0x8e   : > { %1594 = vmatprep.mubr.f32.mxu1 %v2316_v28  ;;  %1617 = vmatpush3.msra.mxu1 %v670_v27 }
  0x8f   : > { %1571 = vmatmul.mubr.f32.gmra.mxu0 %v2320_v29  ;;  %1618 = vmatprep.subr.mxu1 %v669_v30 }
  0x90   : > { %1573 = vmatprep.mubr.f32.mxu0 %v2323_v31  ;;  %1619 = vmatpush3.msra.mxu1 %v669_v30 }
  0x91   : > { %1595 = vmatmul.mubr.f32.gmra.mxu1 %v2328_v32  ;;  %1620 = vmatprep.subr.mxu1 %v668_v33 }
  0x92   : > { %1597 = vmatprep.mubr.f32.mxu1 %v2332_v34  ;;  %1621 = vmatpush3.msra.mxu1 %v668_v33 }
  0x93   : > { %1574 = vmatmul.mubr.f32.gmra.mxu0 %v2336_v35  ;;  %1622 = vmatprep.subr.mxu1 %v667_v36 }
  0x94   : > { %1576 = vmatprep.mubr.f32.mxu0 %v2339_v37  ;;  %1623 = vmatpush3.msra.mxu1 %v667_v36 }
  0x95   : > { %1598 = vmatmul.mubr.f32.gmra.mxu1 %v2344_v38  ;;  %1624 = vmatprep.subr.mxu1 %v666_v39 }
  0x96   : > { %1600 = vmatprep.mubr.f32.mxu1 %v2348_v40  ;;  %1625 = vmatpush3.msra.mxu1 %v666_v39 }
  0x97   : > { %1577 = vmatmul.mubr.f32.gmra.mxu0 %v2352_v41  ;;  %1626 = vmatprep.subr.mxu1 %v665_v42 }
  0x98   : > { %1579 = vmatprep.mubr.f32.mxu0 %v2355_v43  ;;  %1627 = vmatpush3.msra.mxu1 %v665_v42 }
  0x99   : > { %1601 = vmatmul.mubr.f32.gmra.mxu1 %v2360_v44  ;;  %1628 = vmatprep.subr.mxu1 %v664_v45 }
  0x9a   : > { %1603 = vmatprep.mubr.f32.mxu1 %v2364_v46  ;;  %1629 = vmatpush3.msra.mxu1 %v664_v45 }
  0x9b   : > { %1580 = vmatmul.mubr.f32.gmra.mxu0 %v2368_v47  ;;  %1630 = vmatprep.subr.mxu1 %v663_v48 }
  0x9c   : > { %1582 = vmatprep.mubr.f32.mxu0 %v2371_v49  ;;  %1631 = vmatpush3.msra.mxu1 %v663_v48 }
  0x9d   : > { %1604 = vmatmul.mubr.f32.gmra.mxu1 %v2376_v50  ;;  %1632 = vmatprep.subr.mxu1 %v662_v51 }
  0x9e   : > { %1606 = vmatprep.mubr.f32.mxu1 %v2380_v52  ;;  %1633 = vmatpush3.msra.mxu1 %v662_v51 }
  0x9f   : > { %1583 = vmatmul.mubr.f32.gmra.mxu0 %v2384_v53  ;;  %1634 = vmatprep.subr.mxu1 %v661_v54 }
  0xa0   : > { %1585 = vmatprep.mubr.f32.mxu0 %v2387_v55  ;;  %1635 = vmatpush3.msra.mxu1 %v661_v54 }
  0xa1   : > { %1607 = vmatmul.mubr.f32.gmra.mxu1 %v2392_v56  ;;  %1636 = vmatprep.subr.mxu1 %v660_v57 }
  0xa2   : > { %1609 = vmatprep.mubr.f32.mxu1 %v2396_v58  ;;  %1637 = vmatpush3.msra.mxu1 %v660_v57 }
  0xa3   : > { %1586 = vmatmul.mubr.f32.gmra.mxu0 %v2400_v59  ;;  %1638 = vmatprep.subr.mxu1 %v659_v61 }
  0xa4   : > { %1639 = vmatpush3.msra.mxu1 %v659_v61  ;;  %1692 = vmatprep.subr.mxu0 %v951_v0 }
  0xa5   : > { %1610 = vmatmul.mubr.f32.gmra.mxu1 %v2405_v60  ;;  %1640 = vmatprep.subr.mxu1 %v658_v62 }
  0xa6   : > { %1641 = vmatpush3.msra.mxu1 %v658_v62  ;;  %1693 = vmatpush3.msra.mxu0 %v951_v0 }
  0xa7   : > { %1642 = vmatprep.subr.mxu1 %v657_v63  ;;  %1694 = vmatprep.subr.mxu0 %v950_v1 }
  0xa8   : > { %1643 = vmatpush3.msra.mxu1 %v657_v63  ;;  %1695 = vmatpush3.msra.mxu0 %v950_v1 }
  0xa9   : > { %1696 = vmatprep.subr.mxu0 %v949_v2 }
  0xaa   : > { %1697 = vmatpush3.msra.mxu0 %v949_v2 }
  0xab   : > { %1698 = vmatprep.subr.mxu0 %v948_v3 }
  0xac   : > { %1699 = vmatpush3.msra.mxu0 %v948_v3 }
  0xad   : > { %1700 = vmatprep.subr.mxu0 %v947_v5 }
  0xae   : > { %1701 = vmatpush3.msra.mxu0 %v947_v5 }
  0xaf   : > { %1702 = vmatprep.subr.mxu0 %v946_v6 }
  0xb0   : > { %1703 = vmatpush3.msra.mxu0 %v946_v6 }
  0xb1   : > { %1704 = vmatprep.subr.mxu0 %v945_v7 }
  0xb2   : > { %1705 = vmatpush3.msra.mxu0 %v945_v7 }
  0xb3   : > { %1706 = vmatprep.subr.mxu0 %v944_v8 }
  0xb4   : > { %1707 = vmatpush3.msra.mxu0 %v944_v8 }
  0xb5   : > { %1708 = vmatprep.subr.mxu0 %v943_v9 }
  0xb6   : > { %1709 = vmatpush3.msra.mxu0 %v943_v9 }
  0xb7   : > { %1710 = vmatprep.subr.mxu0 %v942_v10 }
  0xb8   : > { %1711 = vmatpush3.msra.mxu0 %v942_v10 }
  0xb9   : > { %1712 = vmatprep.subr.mxu0 %v941_v11 }
  0xba   : > { %1713 = vmatpush3.msra.mxu0 %v941_v11 }
  0xbb   : > { %1714 = vmatprep.subr.mxu0 %v940_v12 }
  0xbc   : > { %1715 = vmatpush3.msra.mxu0 %v940_v12 }
  0xbd   : > { %1716 = vmatprep.subr.mxu0 %v939_v13 }
  0xbe   : > { %1717 = vmatpush3.msra.mxu0 %v939_v13 }
 0x147   : > { %v1566_v15 = vpop.f32.mrf.mxu0 }
 0x148   : > { %v472_v16 = vadd.f32 %v1566_v15, %v2412_v14 }
 0x149   : > { %v466_v21 = vpop.f32.mrf.mxu0  ;;  %v2415_v24 = vpop.f32.mrf.mxu1 }
 0x14a   : > { %v467_v27 = vadd.f32 %v2412_v14, %v466_v21  ;;  %v626_v39 = vmax.f32 %v472_v16, 0.0 }
 0x14b   : > { %v1569_v30 = vpop.f32.mrf.mxu0  ;;  %v546_v33 = vpop.f32.mrf.mxu1 }
 0x14c   : > { %v625_v36 = vmax.f32 %v467_v27, 0.0  ;;  %v482_v42 = vadd.f32 %v1569_v30, %v2412_v14 }
 0x14d   : > { %v476_v45 = vpop.f32.mrf.mxu0  ;;  %v2419_v48 = vpop.f32.mrf.mxu1 }
 0x14e   : > { %v477_v51 = vadd.f32 %v2412_v14, %v476_v45  ;;  %1644 = vmatprep.mubr.f32.mxu1 %v625_v36  ;;  %v628_v62 = vmax.f32 %v482_v42, 0.0 }
 0x14f   : > { %v1572_v54 = vpop.f32.mrf.mxu0  ;;  %1645 = vmatmul.mubr.f32.vlgmr.msra.gmra.mxu1 %v626_v39  ;;  %v556_v57 = vpop.f32.mrf.mxu1 }
 0x150   : > { %v627_v61 = vmax.f32 %v477_v51, 0.0  ;;  %v492_v63 = vadd.f32 %v1572_v54, %v2412_v14 }
 0x151   : > { %v486_v0 = vpop.f32.mrf.mxu0  ;;  %v2423_v1 = vpop.f32.mrf.mxu1 }
 0x152   : > { %v487_v2 = vadd.f32 %v2412_v14, %v486_v0  ;;  %1647 = vmatprep.mubr.f32.mxu1 %v627_v61  ;;  %v630_v6 = vmax.f32 %v492_v63, 0.0 }
 0x153   : > { %v1575_v3 = vpop.f32.mrf.mxu0  ;;  %1648 = vmatmul.mubr.f32.gmra.mxu1 %v628_v62  ;;  %v566_v9 = vpop.f32.mrf.mxu1 }
 0x154   : > { %v629_v5 = vmax.f32 %v487_v2, 0.0  ;;  %v502_v7 = vadd.f32 %v1575_v3, %v2412_v14 }
 0x155   : > { %v496_v8 = vpop.f32.mrf.mxu0  ;;  %v1599_v21 = vpop.f32.mrf.mxu1 }
 0x156   : > { %v497_v10 = vadd.f32 %v2412_v14, %v496_v8  ;;  %1650 = vmatprep.mubr.f32.mxu1 %v629_v5  ;;  %v632_v13 = vmax.f32 %v502_v7, 0.0  ;;  %v547_v8 = vadd.f32 %v2412_v14, %v546_v33 }
 0x157   : > { %v1578_v11 = vpop.f32.mrf.mxu0  ;;  %1651 = vmatmul.mubr.f32.gmra.mxu1 %v630_v6  ;;  %v576_v51 = vpop.f32.mrf.mxu1 }
 0x158   : > { %v631_v12 = vmax.f32 %v497_v10, 0.0  ;;  %v512_v15 = vadd.f32 %v1578_v11, %v2412_v14 }
 0x159   : > { %v506_v16 = vpop.f32.mrf.mxu0  ;;  %v1602_v3 = vpop.f32.mrf.mxu1 }
 0x15a   : > { %v507_v27 = vadd.f32 %v2412_v14, %v506_v16  ;;  %1653 = vmatprep.mubr.f32.mxu1 %v631_v12  ;;  %v634_v39 = vmax.f32 %v512_v15, 0.0 }
 0x15b   : > { %v1581_v30 = vpop.f32.mrf.mxu0  ;;  %1654 = vmatmul.mubr.f32.gmra.mxu1 %v632_v13  ;;  %v586_v13 = vpop.f32.mrf.mxu1 }
 0x15c   : > { %v633_v36 = vmax.f32 %v507_v27, 0.0  ;;  %v522_v42 = vadd.f32 %v1581_v30, %v2412_v14  ;;  %v641_v27 = vmax.f32 %v547_v8, 0.0  ;;  %v557_v30 = vadd.f32 %v2412_v14, %v556_v57 }
 0x15d   : > { %v516_v45 = vpop.f32.mrf.mxu0  ;;  %v577_v57 = vadd.f32 %v2412_v14, %v576_v51 }
 0x15e   : > { %v517_v54 = vadd.f32 %v2412_v14, %v516_v45  ;;  %1656 = vmatprep.mubr.f32.mxu1 %v633_v36  ;;  %v636_v63 = vmax.f32 %v522_v42, 0.0  ;;  %v1605_v42 = vpop.f32.mrf.mxu1  ;;  %v643_v33 = vmax.f32 %v557_v30, 0.0  ;;  %v567_v45 = vadd.f32 %v2412_v14, %v566_v9 }
 0x15f   : > { %v1584_v61 = vpop.f32.mrf.mxu0  ;;  %1657 = vmatmul.mubr.f32.gmra.mxu1 %v634_v39  ;;  %v552_v39 = vadd.f32 %v2415_v24, %v2412_v14  ;;  %v572_v24 = vadd.f32 %v2423_v1, %v2412_v14  ;;  %v587_v9 = vadd.f32 %v2412_v14, %v586_v13  ;;  %v602_v13 = vadd.f32 %v1605_v42, %v2412_v14  ;;  %v938_v42 = vld [vmem:[#allocation8 + $0x10] sm:$0xff] }
 0x160   : > { %v635_v62 = vmax.f32 %v517_v54, 0.0  ;;  %v532_v0 = vadd.f32 %v1584_v61, %v2412_v14  ;;  %v562_v61 = vadd.f32 %v2419_v48, %v2412_v14  ;;  %1718 = vmatprep.subr.mxu0 %v938_v42 }
 0x161   : > { %v526_v2 = vpop.f32.mrf.mxu0  ;;  %v642_v54 = vmax.f32 %v552_v39, 0.0  ;;  %v649_v8 = vmax.f32 %v587_v9, 0.0  ;;  %1719 = vmatpush3.msra.mxu0 %v938_v42 }
 0x162   : > { %v527_v5 = vadd.f32 %v2412_v14, %v526_v2  ;;  %1659 = vmatprep.mubr.f32.mxu1 %v635_v62  ;;  %v638_v10 = vmax.f32 %v532_v0, 0.0  ;;  %v596_v62 = vpop.f32.mrf.mxu1  ;;  %v644_v0 = vmax.f32 %v562_v61, 0.0  ;;  %v937_v61 = vld [vmem:[#allocation8 + $0x8] sm:$0xff] }
 0x163   : > { %v1587_v6 = vpop.f32.mrf.mxu0  ;;  %1660 = vmatmul.mubr.f32.gmra.mxu1 %v636_v63  ;;  %v645_v63 = vmax.f32 %v567_v45, 0.0  ;;  %1720 = vmatprep.subr.mxu0 %v937_v61 }
 0x164   : > { %v637_v7 = vmax.f32 %v527_v5, 0.0  ;;  %v542_v11 = vadd.f32 %v1587_v6, %v2412_v14  ;;  %v1608_v2 = vpop.f32.mrf.mxu1  ;;  %v647_v5 = vmax.f32 %v577_v57, 0.0  ;;  %v646_v6 = vmax.f32 %v572_v24, 0.0  ;;  %1721 = vmatpush3.msra.mxu0 %v937_v61 }
 0x165   : > { %v536_v12 = vpop.f32.mrf.mxu0  ;;  %v612_v39 = vadd.f32 %v1608_v2, %v2412_v14 }
 0x166   : > { %v537_v15 = vadd.f32 %v2412_v14, %v536_v12  ;;  %1662 = vmatprep.mubr.f32.mxu1 %v637_v7  ;;  %v640_v36 = vmax.f32 %v542_v11, 0.0  ;;  %v582_v7 = vadd.f32 %v1599_v21, %v2412_v14  ;;  %v606_v48 = vpop.f32.mrf.mxu1  ;;  %v592_v11 = vadd.f32 %v1602_v3, %v2412_v14 }
 0x167   : > { %1663 = vmatmul.mubr.f32.gmra.mxu1 %v638_v10  ;;  %v597_v10 = vadd.f32 %v2412_v14, %v596_v62  ;;  %v936_v62 = vld [vmem:[#allocation8] sm:$0xff] }
 0x168   : > { %v639_v16 = vmax.f32 %v537_v15, 0.0  ;;  %v648_v51 = vmax.f32 %v582_v7, 0.0  ;;  %v1611_v12 = vpop.f32.mrf.mxu1  ;;  %v607_v15 = vadd.f32 %v2412_v14, %v606_v48  ;;  %1722 = vmatprep.subr.mxu0 %v936_v62 }
 0x169   : > { %v651_v1 = vmax.f32 %v597_v10, 0.0  ;;  %v622_v45 = vadd.f32 %v1611_v12, %v2412_v14  ;;  %1723 = vmatpush3.msra.mxu0 %v936_v62 }
 0x16a   : > { %1665 = vmatprep.mubr.f32.mxu1 %v639_v16  ;;  %v650_v16 = vmax.f32 %v592_v11, 0.0  ;;  %v653_v21 = vmax.f32 %v607_v15, 0.0 }
 0x16b   : > { %1666 = vmatmul.mubr.f32.gmra.mxu1 %v640_v36  ;;  %v652_v36 = vmax.f32 %v602_v13, 0.0 }
 0x16c   : > { %1668 = vmatprep.mubr.f32.mxu1 %v641_v27  ;;  %v616_v27 = vpop.f32.mrf.mxu1 }
 0x16d   : > { %v617_v30 = vadd.f32 %v2412_v14, %v616_v27 }
 0x16f   : > { %1669 = vmatmul.mubr.f32.gmra.mxu1 %v642_v54  ;;  %v655_v3 = vmax.f32 %v617_v30, 0.0  ;;  %v656_v54 = vmax.f32 %v622_v45, 0.0 }
 0x170   : > { %1671 = vmatprep.mubr.f32.mxu1 %v643_v33  ;;  %v654_v33 = vmax.f32 %v612_v39, 0.0 }
 0x173   : > { %1672 = vmatmul.mubr.f32.gmra.mxu1 %v644_v0 }
 0x174   : > { %1674 = vmatprep.mubr.f32.mxu1 %v645_v63  ;;  %v2458_v63 = vld [vmem:[%s2651_s4] ss:$0 sm:$0xff] }
 0x177   : > { %1675 = vmatmul.mubr.f32.gmra.mxu1 %v646_v6 }
 0x178   : > { %1677 = vmatprep.mubr.f32.mxu1 %v647_v5 }
 0x17b   : > { %1678 = vmatmul.mubr.f32.gmra.mxu1 %v648_v51 }
 0x17c   : > { %1680 = vmatprep.mubr.f32.mxu1 %v649_v8 }
 0x17f   : > { %1681 = vmatmul.mubr.f32.gmra.mxu1 %v650_v16 }
 0x180   : > { %1683 = vmatprep.mubr.f32.mxu1 %v651_v1 }
 0x183   : > { %1684 = vmatmul.mubr.f32.gmra.mxu1 %v652_v36 }
 0x184   : > { %1686 = vmatprep.mubr.f32.mxu1 %v653_v21 }
 0x187   : > { %1687 = vmatmul.mubr.f32.gmra.mxu1 %v654_v33 }
 0x188   : > { %1689 = vmatprep.mubr.f32.mxu1 %v655_v3 }
 0x18b   : > { %1690 = vmatmul.mubr.f32.gmra.mxu1 %v656_v54 }
 0x20f   : > { %v1646_v57 = vpop.f32.mrf.mxu1 }
 0x210   : > { %v751_v14 = vadd.f32 %v1646_v57, %v2458_v63 }
 0x211   : > { %v745_v0 = vpop.f32.mrf.mxu1 }
 0x212   : > { %v746_v24 = vadd.f32 %v2458_v63, %v745_v0  ;;  %v905_v9 = vmax.f32 %v751_v14, 0.0 }
 0x213   : > { %v1649_v2 = vpop.f32.mrf.mxu1 }
 0x214   : > { %v904_v5 = vmax.f32 %v746_v24, 0.0  ;;  %v761_v6 = vadd.f32 %v1649_v2, %v2458_v63 }
 0x215   : > { %v755_v7 = vpop.f32.mrf.mxu1 }
 0x216   : > { %v756_v48 = vadd.f32 %v2458_v63, %v755_v7  ;;  %1724 = vmatprep.mubr.f32.mxu0 %v904_v5  ;;  %v907_v51 = vmax.f32 %v761_v6, 0.0 }
 0x217   : > { %v1652_v8 = vpop.f32.mrf.mxu1  ;;  %1725 = vmatmul.mubr.f32.vlgmr.msra.gmra.mxu0 %v905_v9 }
 0x218   : > { %v906_v10 = vmax.f32 %v756_v48, 0.0  ;;  %v771_v11 = vadd.f32 %v1652_v8, %v2458_v63 }
 0x219   : > { %v765_v12 = vpop.f32.mrf.mxu1 }
 0x21a   : > { %v766_v1 = vadd.f32 %v2458_v63, %v765_v12  ;;  %1727 = vmatprep.mubr.f32.mxu0 %v906_v10  ;;  %v909_v13 = vmax.f32 %v771_v11, 0.0 }
 0x21b   : > { %v1655_v15 = vpop.f32.mrf.mxu1  ;;  %1728 = vmatmul.mubr.f32.gmra.mxu0 %v907_v51 }
 0x21c   : > { %v908_v16 = vmax.f32 %v766_v1, 0.0  ;;  %v781_v27 = vadd.f32 %v1655_v15, %v2458_v63 }
 0x21d   : > { %v775_v21 = vpop.f32.mrf.mxu1 }
 0x21e   : > { %v776_v30 = vadd.f32 %v2458_v63, %v775_v21  ;;  %1730 = vmatprep.mubr.f32.mxu0 %v908_v16  ;;  %v911_v3 = vmax.f32 %v781_v27, 0.0 }
 0x21f   : > { %v1658_v36 = vpop.f32.mrf.mxu1  ;;  %1731 = vmatmul.mubr.f32.gmra.mxu0 %v909_v13 }
 0x220   : > { %v910_v39 = vmax.f32 %v776_v30, 0.0  ;;  %v791_v33 = vadd.f32 %v1658_v36, %v2458_v63 }
 0x221   : > { %v785_v45 = vpop.f32.mrf.mxu1 }
 0x222   : > { %v786_v54 = vadd.f32 %v2458_v63, %v785_v45  ;;  %1733 = vmatprep.mubr.f32.mxu0 %v910_v39  ;;  %v913_v62 = vmax.f32 %v791_v33, 0.0 }
 0x223   : > { %v1661_v42 = vpop.f32.mrf.mxu1  ;;  %1734 = vmatmul.mubr.f32.gmra.mxu0 %v911_v3 }
 0x224   : > { %v912_v61 = vmax.f32 %v786_v54, 0.0  ;;  %v801_v57 = vadd.f32 %v1661_v42, %v2458_v63 }
 0x225   : > { %v795_v14 = vpop.f32.mrf.mxu1 }
 0x226   : > { %v796_v0 = vadd.f32 %v2458_v63, %v795_v14  ;;  %1736 = vmatprep.mubr.f32.mxu0 %v912_v61  ;;  %v915_v5 = vmax.f32 %v801_v57, 0.0 }
 0x227   : > { %v1664_v24 = vpop.f32.mrf.mxu1  ;;  %1737 = vmatmul.mubr.f32.gmra.mxu0 %v913_v62 }
 0x228   : > { %v914_v2 = vmax.f32 %v796_v0, 0.0  ;;  %v811_v9 = vadd.f32 %v1664_v24, %v2458_v63 }
 0x229   : > { %v805_v6 = vpop.f32.mrf.mxu1 }
 0x22a   : > { %v806_v7 = vadd.f32 %v2458_v63, %v805_v6  ;;  %1739 = vmatprep.mubr.f32.mxu0 %v914_v2  ;;  %v917_v10 = vmax.f32 %v811_v9, 0.0 }
 0x22b   : > { %v1667_v48 = vpop.f32.mrf.mxu1  ;;  %1740 = vmatmul.mubr.f32.gmra.mxu0 %v915_v5 }
 0x22c   : > { %v916_v8 = vmax.f32 %v806_v7, 0.0  ;;  %v821_v51 = vadd.f32 %v1667_v48, %v2458_v63 }
 0x22d   : > { %v815_v11 = vpop.f32.mrf.mxu1 }
 0x22e   : > { %v816_v12 = vadd.f32 %v2458_v63, %v815_v11  ;;  %1742 = vmatprep.mubr.f32.mxu0 %v916_v8  ;;  %v919_v16 = vmax.f32 %v821_v51, 0.0 }
 0x22f   : > { %v1670_v1 = vpop.f32.mrf.mxu1  ;;  %1743 = vmatmul.mubr.f32.gmra.mxu0 %v917_v10 }
 0x230   : > { %v918_v15 = vmax.f32 %v816_v12, 0.0  ;;  %v831_v13 = vadd.f32 %v1670_v1, %v2458_v63 }
 0x231   : > { %v825_v27 = vpop.f32.mrf.mxu1 }
 0x232   : > { %v826_v21 = vadd.f32 %v2458_v63, %v825_v27  ;;  %1745 = vmatprep.mubr.f32.mxu0 %v918_v15  ;;  %v921_v39 = vmax.f32 %v831_v13, 0.0 }
 0x233   : > { %v1673_v30 = vpop.f32.mrf.mxu1  ;;  %1746 = vmatmul.mubr.f32.gmra.mxu0 %v919_v16 }
 0x234   : > { %v920_v36 = vmax.f32 %v826_v21, 0.0  ;;  %v841_v3 = vadd.f32 %v1673_v30, %v2458_v63 }
 0x235   : > { %v835_v33 = vpop.f32.mrf.mxu1 }
 0x236   : > { %v836_v45 = vadd.f32 %v2458_v63, %v835_v33  ;;  %1748 = vmatprep.mubr.f32.mxu0 %v920_v36  ;;  %v923_v61 = vmax.f32 %v841_v3, 0.0 }
 0x237   : > { %v1676_v54 = vpop.f32.mrf.mxu1  ;;  %1749 = vmatmul.mubr.f32.gmra.mxu0 %v921_v39 }
 0x238   : > { %v922_v42 = vmax.f32 %v836_v45, 0.0  ;;  %v851_v62 = vadd.f32 %v1676_v54, %v2458_v63 }
 0x239   : > { %v845_v57 = vpop.f32.mrf.mxu1 }
 0x23a   : > { %v846_v14 = vadd.f32 %v2458_v63, %v845_v57  ;;  %1751 = vmatprep.mubr.f32.mxu0 %v922_v42  ;;  %v925_v2 = vmax.f32 %v851_v62, 0.0 }
 0x23b   : > { %v1679_v0 = vpop.f32.mrf.mxu1  ;;  %1752 = vmatmul.mubr.f32.gmra.mxu0 %v923_v61 }
 0x23c   : > { %v924_v24 = vmax.f32 %v846_v14, 0.0  ;;  %v861_v5 = vadd.f32 %v1679_v0, %v2458_v63 }
 0x23d   : > { %v855_v9 = vpop.f32.mrf.mxu1 }
 0x23e   : > { %v856_v6 = vadd.f32 %v2458_v63, %v855_v9  ;;  %1754 = vmatprep.mubr.f32.mxu0 %v924_v24  ;;  %v927_v8 = vmax.f32 %v861_v5, 0.0  ;;  %v2495_v24 = vld [vmem:[%s2653_s6] ss:$0 sm:$0xff] }
 0x23f   : > { %v1682_v7 = vpop.f32.mrf.mxu1  ;;  %1755 = vmatmul.mubr.f32.gmra.mxu0 %v925_v2 }
 0x240   : > { %v926_v48 = vmax.f32 %v856_v6, 0.0  ;;  %v871_v10 = vadd.f32 %v1682_v7, %v2458_v63 }
 0x241   : > { %v865_v51 = vpop.f32.mrf.mxu1 }
 0x242   : > { %v866_v11 = vadd.f32 %v2458_v63, %v865_v51  ;;  %1757 = vmatprep.mubr.f32.mxu0 %v926_v48  ;;  %v929_v15 = vmax.f32 %v871_v10, 0.0 }
 0x243   : > { %v1685_v12 = vpop.f32.mrf.mxu1  ;;  %1758 = vmatmul.mubr.f32.gmra.mxu0 %v927_v8 }
 0x244   : > { %v928_v1 = vmax.f32 %v866_v11, 0.0  ;;  %v881_v16 = vadd.f32 %v1685_v12, %v2458_v63 }
 0x245   : > { %v875_v13 = vpop.f32.mrf.mxu1 }
 0x246   : > { %v876_v27 = vadd.f32 %v2458_v63, %v875_v13  ;;  %1760 = vmatprep.mubr.f32.mxu0 %v928_v1  ;;  %v931_v36 = vmax.f32 %v881_v16, 0.0 }
 0x247   : > { %v1688_v21 = vpop.f32.mrf.mxu1  ;;  %1761 = vmatmul.mubr.f32.gmra.mxu0 %v929_v15 }
 0x248   : > { %v930_v30 = vmax.f32 %v876_v27, 0.0  ;;  %v891_v39 = vadd.f32 %v1688_v21, %v2458_v63 }
 0x249   : > { %v885_v3 = vpop.f32.mrf.mxu1 }
 0x24a   : > { %v886_v33 = vadd.f32 %v2458_v63, %v885_v3  ;;  %1763 = vmatprep.mubr.f32.mxu0 %v930_v30  ;;  %v933_v42 = vmax.f32 %v891_v39, 0.0 }
 0x24b   : > { %v1691_v45 = vpop.f32.mrf.mxu1  ;;  %1764 = vmatmul.mubr.f32.gmra.mxu0 %v931_v36 }
 0x24c   : > { %v932_v54 = vmax.f32 %v886_v33, 0.0  ;;  %v901_v61 = vadd.f32 %v1691_v45, %v2458_v63 }
 0x24d   : > { %v895_v62 = vpop.f32.mrf.mxu1 }
 0x24e   : > { %v896_v57 = vadd.f32 %v2458_v63, %v895_v62  ;;  %1766 = vmatprep.mubr.f32.mxu0 %v932_v54  ;;  %v935_v0 = vmax.f32 %v901_v61, 0.0 }
 0x24f   : > { %1767 = vmatmul.mubr.f32.gmra.mxu0 %v933_v42 }
 0x250   : > { %v934_v14 = vmax.f32 %v896_v57, 0.0 }
 0x252   : > { %1769 = vmatprep.mubr.f32.mxu0 %v934_v14 }
 0x253   : > { %1770 = vmatmul.mubr.f32.gmra.mxu0 %v935_v0 }
 0x2d7   : > { %v1726_v2 = vpop.f32.mrf.mxu0 }
 0x2d8   : > { %v1030_v5 = vadd.f32 %v1726_v2, %v2495_v24 }
 0x2d9   : > { %v1024_v9 = vpop.f32.mrf.mxu0 }
 0x2da   : > { %v1184_v6 = vadd.f32 %v1030_v5, %v2286_v17  ;;  %v1025_v7 = vadd.f32 %v2495_v24, %v1024_v9 }
 0x2db   : > { %v1729_v63 = vpop.f32.mrf.mxu0 }
 0x2dc   : > { %1216 = vst [vmem:[%s2502_s11 + $0x8] sm:$0xff] %v1184_v6  ;;  %v1183_v48 = vadd.f32 %v1025_v7, %v2282_v4  ;;  %v1040_v8 = vadd.f32 %v1729_v63, %v2495_v24 }
 0x2dd   : > { %v1034_v10 = vpop.f32.mrf.mxu0 }
 0x2de   : > { %1215 = vst [vmem:[%s2502_s11] sm:$0xff] %v1183_v48  ;;  %v1186_v17 = vadd.f32 %v1040_v8, %v2303_v23  ;;  %v1035_v51 = vadd.f32 %v2495_v24, %v1034_v10 }
 0x2df   : > { %v1732_v11 = vpop.f32.mrf.mxu0 }
 0x2e0   : > { %1218 = vst [vmem:[%s2502_s11 + $0x18] sm:$0xff] %v1186_v17  ;;  %v1185_v12 = vadd.f32 %v1035_v51, %v2289_v18  ;;  %v1050_v1 = vadd.f32 %v1732_v11, %v2495_v24 }
 0x2e1   : > { %v1044_v15 = vpop.f32.mrf.mxu0 }
 0x2e2   : > { %1217 = vst [vmem:[%s2502_s11 + $0x10] sm:$0xff] %v1185_v12  ;;  %v1188_v4 = vadd.f32 %v1050_v1, %v2320_v29  ;;  %v1045_v16 = vadd.f32 %v2495_v24, %v1044_v15 }
 0x2e3   : > { %v1735_v13 = vpop.f32.mrf.mxu0 }
 0x2e4   : > { %1220 = vst [vmem:[%s2502_s11 + $0x28] sm:$0xff] %v1188_v4  ;;  %v1187_v23 = vadd.f32 %v1045_v16, %v2307_v25  ;;  %v1060_v27 = vadd.f32 %v1735_v13, %v2495_v24 }
 0x2e5   : > { %v1054_v21 = vpop.f32.mrf.mxu0 }
 0x2e6   : > { %1219 = vst [vmem:[%s2502_s11 + $0x20] sm:$0xff] %v1187_v23  ;;  %v1190_v18 = vadd.f32 %v1060_v27, %v2336_v35  ;;  %v1055_v30 = vadd.f32 %v2495_v24, %v1054_v21 }
 0x2e7   : > { %v1738_v36 = vpop.f32.mrf.mxu0 }
 0x2e8   : > { %1222 = vst [vmem:[%s2502_s11 + $0x38] sm:$0xff] %v1190_v18  ;;  %v1189_v29 = vadd.f32 %v1055_v30, %v2323_v31  ;;  %v1070_v39 = vadd.f32 %v1738_v36, %v2495_v24 }
 0x2e9   : > { %v1064_v3 = vpop.f32.mrf.mxu0 }
 0x2ea   : > { %1221 = vst [vmem:[%s2502_s11 + $0x30] sm:$0xff] %v1189_v29  ;;  %v1192_v25 = vadd.f32 %v1070_v39, %v2352_v41  ;;  %v1065_v33 = vadd.f32 %v2495_v24, %v1064_v3 }
 0x2eb   : > { %v1741_v45 = vpop.f32.mrf.mxu0 }
 0x2ec   : > { %1224 = vst [vmem:[%s2502_s11 + $0x48] sm:$0xff] %v1192_v25  ;;  %v1191_v35 = vadd.f32 %v1065_v33, %v2339_v37  ;;  %v1080_v54 = vadd.f32 %v1741_v45, %v2495_v24 }
 0x2ed   : > { %v1074_v42 = vpop.f32.mrf.mxu0 }
 0x2ee   : > { %1223 = vst [vmem:[%s2502_s11 + $0x40] sm:$0xff] %v1191_v35  ;;  %v1194_v31 = vadd.f32 %v1080_v54, %v2368_v47  ;;  %v1075_v61 = vadd.f32 %v2495_v24, %v1074_v42 }
 0x2ef   : > { %v1744_v62 = vpop.f32.mrf.mxu0 }
 0x2f0   : > { %1226 = vst [vmem:[%s2502_s11 + $0x58] sm:$0xff] %v1194_v31  ;;  %v1193_v41 = vadd.f32 %v1075_v61, %v2355_v43  ;;  %v1090_v57 = vadd.f32 %v1744_v62, %v2495_v24 }
 0x2f1   : > { %v1084_v14 = vpop.f32.mrf.mxu0 }
 0x2f2   : > { %1225 = vst [vmem:[%s2502_s11 + $0x50] sm:$0xff] %v1193_v41  ;;  %v1196_v37 = vadd.f32 %v1090_v57, %v2384_v53  ;;  %v1085_v0 = vadd.f32 %v2495_v24, %v1084_v14 }
 0x2f3   : > { %v1747_v2 = vpop.f32.mrf.mxu0 }
 0x2f4   : > { %1228 = vst [vmem:[%s2502_s11 + $0x68] sm:$0xff] %v1196_v37  ;;  %v1195_v47 = vadd.f32 %v1085_v0, %v2371_v49  ;;  %v1100_v5 = vadd.f32 %v1747_v2, %v2495_v24 }
 0x2f5   : > { %v1094_v9 = vpop.f32.mrf.mxu0 }
 0x2f6   : > { %1227 = vst [vmem:[%s2502_s11 + $0x60] sm:$0xff] %v1195_v47  ;;  %v1198_v43 = vadd.f32 %v1100_v5, %v2400_v59  ;;  %v1095_v6 = vadd.f32 %v2495_v24, %v1094_v9 }
 0x2f7   : > { %v1750_v7 = vpop.f32.mrf.mxu0 }
 0x2f8   : > { %1230 = vst [vmem:[%s2502_s11 + $0x78] sm:$0xff] %v1198_v43  ;;  %v1197_v53 = vadd.f32 %v1095_v6, %v2387_v55  ;;  %v1110_v63 = vadd.f32 %v1750_v7, %v2495_v24 }
 0x2f9   : > { %v1104_v48 = vpop.f32.mrf.mxu0 }
 0x2fa   : > { %1229 = vst [vmem:[%s2502_s11 + $0x70] sm:$0xff] %v1197_v53  ;;  %v1200_v49 = vadd.f32 %v1110_v63, %v2295_v20  ;;  %v1105_v8 = vadd.f32 %v2495_v24, %v1104_v48 }
 0x2fb   : > { %v1753_v10 = vpop.f32.mrf.mxu0 }
 0x2fc   : > { %1232 = vst [vmem:[%s2502_s11 + $0x88] sm:$0xff] %v1200_v49  ;;  %v1199_v59 = vadd.f32 %v1105_v8, %v2292_v19  ;;  %v1120_v17 = vadd.f32 %v1753_v10, %v2495_v24 }
 0x2fd   : > { %v1114_v51 = vpop.f32.mrf.mxu0 }
 0x2fe   : > { %1231 = vst [vmem:[%s2502_s11 + $0x80] sm:$0xff] %v1199_v59  ;;  %v1202_v55 = vadd.f32 %v1120_v17, %v2312_v26  ;;  %v1115_v11 = vadd.f32 %v2495_v24, %v1114_v51 }
 0x2ff   : > { %v1756_v12 = vpop.f32.mrf.mxu0 }
 0x300   : > { %1234 = vst [vmem:[%s2502_s11 + $0x98] sm:$0xff] %v1202_v55  ;;  %v1201_v20 = vadd.f32 %v1115_v11, %v2299_v22  ;;  %v1130_v1 = vadd.f32 %v1756_v12, %v2495_v24 }
 0x301   : > { %v1124_v15 = vpop.f32.mrf.mxu0 }
 0x302   : > { %1233 = vst [vmem:[%s2502_s11 + $0x90] sm:$0xff] %v1201_v20  ;;  %v1204_v19 = vadd.f32 %v1130_v1, %v2328_v32  ;;  %v1125_v4 = vadd.f32 %v2495_v24, %v1124_v15 }
 0x303   : > { %v1759_v16 = vpop.f32.mrf.mxu0 }
 0x304   : > { %1236 = vst [vmem:[%s2502_s11 + $0xa8] sm:$0xff] %v1204_v19  ;;  %v1203_v26 = vadd.f32 %v1125_v4, %v2316_v28  ;;  %v1140_v13 = vadd.f32 %v1759_v16, %v2495_v24 }
 0x305   : > { %v1134_v23 = vpop.f32.mrf.mxu0 }
 0x306   : > { %1235 = vst [vmem:[%s2502_s11 + $0xa0] sm:$0xff] %v1203_v26  ;;  %v1206_v22 = vadd.f32 %v1140_v13, %v2344_v38  ;;  %v1135_v27 = vadd.f32 %v2495_v24, %v1134_v23 }
 0x307   : > { %v1762_v21 = vpop.f32.mrf.mxu0 }
 0x308   : > { %1238 = vst [vmem:[%s2502_s11 + $0xb8] sm:$0xff] %v1206_v22  ;;  %v1205_v32 = vadd.f32 %v1135_v27, %v2332_v34  ;;  %v1150_v18 = vadd.f32 %v1762_v21, %v2495_v24 }
 0x309   : > { %v1144_v30 = vpop.f32.mrf.mxu0 }
 0x30a   : > { %1237 = vst [vmem:[%s2502_s11 + $0xb0] sm:$0xff] %v1205_v32  ;;  %v1208_v28 = vadd.f32 %v1150_v18, %v2360_v44  ;;  %v1145_v36 = vadd.f32 %v2495_v24, %v1144_v30 }
 0x30b   : > { %v1765_v29 = vpop.f32.mrf.mxu0 }
 0x30c   : > { %1240 = vst [vmem:[%s2502_s11 + $0xc8] sm:$0xff] %v1208_v28  ;;  %v1207_v38 = vadd.f32 %v1145_v36, %v2348_v40  ;;  %v1160_v39 = vadd.f32 %v1765_v29, %v2495_v24 }
 0x30d   : > { %v1154_v3 = vpop.f32.mrf.mxu0 }
 0x30e   : > { %1239 = vst [vmem:[%s2502_s11 + $0xc0] sm:$0xff] %v1207_v38  ;;  %v1210_v34 = vadd.f32 %v1160_v39, %v2376_v50  ;;  %v1155_v25 = vadd.f32 %v2495_v24, %v1154_v3 }
 0x30f   : > { %v1768_v33 = vpop.f32.mrf.mxu0 }
 0x310   : > { %1242 = vst [vmem:[%s2502_s11 + $0xd8] sm:$0xff] %v1210_v34  ;;  %v1209_v44 = vadd.f32 %v1155_v25, %v2364_v46  ;;  %v1170_v45 = vadd.f32 %v1768_v33, %v2495_v24 }
 0x311   : > { %v1164_v35 = vpop.f32.mrf.mxu0 }
 0x312   : > { %1241 = vst [vmem:[%s2502_s11 + $0xd0] sm:$0xff] %v1209_v44  ;;  %v1212_v40 = vadd.f32 %v1170_v45, %v2392_v56  ;;  %v1165_v54 = vadd.f32 %v2495_v24, %v1164_v35 }
 0x313   : > { %v1771_v42 = vpop.f32.mrf.mxu0 }
 0x314   : > { %1244 = vst [vmem:[%s2502_s11 + $0xe8] sm:$0xff] %v1212_v40  ;;  %v1211_v50 = vadd.f32 %v1165_v54, %v2380_v52  ;;  %v1180_v31 = vadd.f32 %v1771_v42, %v2495_v24 }
 0x315   : > { %v1174_v46 = vpop.f32.mrf.mxu0 }
 0x316   : > { %1243 = vst [vmem:[%s2502_s11 + $0xe0] sm:$0xff] %v1211_v50  ;;  %v1214_v61 = vadd.f32 %v1180_v31, %v2405_v60  ;;  %v1175_v62 = vadd.f32 %v2495_v24, %v1174_v46 }
 0x318   : > { %1246 = vst [vmem:[%s2502_s11 + $0xf8] sm:$0xff] %v1214_v61  ;;  %v1213_v52 = vadd.f32 %v1175_v62, %v2396_v58 }
 0x31a   : > { %1245 = vst [vmem:[%s2502_s11 + $0xf0] sm:$0xff] %v1213_v52 }
 0x31b   : > { %2004 = shalt.err (!%p2001_p10)
}
 0x31c   : > { %s2005_s10 = scalar_lea.hbm %s2599_s1, 4096  ;;  %s2009_s29 = scalar_lea.hbm %s2654_s7, 8192 }
 0x31d   : > { %p2006_p6 = scmp.ne.s32.totalorder %s2599_s1, %s2005_s10  ;;  %p2010_p3 = scmp.lt.s32.totalorder %s2599_s1, %s2654_s7 }
 0x31e   : > { %p2011_p11 = scmp.lt.s32.totalorder %s2009_s29, %s2005_s10 }
 0x31f   : > { %p2007_p4 = pnand %p2006_p6, %p2677_p1 }
 0x320   : > { %p2012_p5 = por %p2011_p11, %p2010_p3 }
 0x321   : > { %p2008_p8 = pneg %p2007_p4 }
 0x323   : > { %p2013_p7 = pnand %p2012_p5, %p2008_p8 }
 0x325   : > { %2016 = shalt.err (!%p2013_p7)
}
 0x326   : > { %s2072_s18 = smov 128   ;;  %s2073_s23 = smov 8  }
 0x327   : > { %1818 = dma.vmem_to_hbm [thread:$0]  (%p2677_p1), %s2601_s22, 4096, %s2599_s1, %s1248_s28, %s2072_s18, %s2072_s18, %s2073_s23  }
 0x328 PF: > { %s1276_s16 = sand.u32 1, %s2051_s24   ;;  %p2678_p12 = scmp.ne.s32.totalorder %s2663_s8, 0 }
 0x329   : > { %p2679_p9 = scmp.ge.s32.totalorder %s2063_s27, 2  ;;  %s1277_s12 = scalar_lea.sflag [#allocation4], %s1276_s16 }
 0x32b   : > { %p1835_p13 = pnand %p2679_p9, %p2678_p12 }
 0x32d   : > { %p1836_p0 = pneg %p1835_p13 }
 0x32f   : > { %2046 = dma.done.wait (%p1836_p0), %s1277_s12, 4096  }
 0x330   : > { %2048 = vsyncadd (%p1836_p0), %s1277_s12, 4294963200  ;;  %p22_p2 = scmp.ge.s32.totalorder %s2203_s14, 4   ;;  %s2680_s24 = smov %s2055_s25 }
 0x331   : > { %s2681_s25 = smov %s2059_s26  ;;  %s2682_s26 = smov %s2213_s17 }
 0x332   : > { %s2683_s27 = smov %s2203_s14  ;;  %24 = sbr.rel (!%p22_p2) target bundleno = 9 (0x9), region = 105 }
 0x337   :  { %1282 = vsyncpa [#allocation3], 1 }
 0x338   :  { %1284 = vsyncpa [#allocation3 + $0x1], 1 }
 0x339   :  { %1285 = vsyncpa [#allocation6], 1 }
 0x33a   :  { %1286 = vsyncpa [#allocation9], 1 }
 0x33b   :  { %1287 = vsyncpa [#allocation4], 1 }
 0x33c   :  { %1289 = vsyncpa [#allocation4 + $0x1], 1 }

</bundles_post_ra>
